<compile_context>
chip_gen: v6e
topology: v6e:2x2x1
jax: 0.10.0
libtpu: 0.0.40
codegen_flags: <defaults>
</compile_context>

<pallas_src>
import functools

import jax
import jax.numpy as jnp
from jax.experimental import pallas as pl
from jax.experimental.pallas import tpu as pltpu


# ----------------------------- fused kernel ---------------------------------

def make_res_block_kernel(Nb, H, W, Cin, Cmid, Cout, KH, pad, has_skip_conv):
    f32 = jnp.float32
    Hp = H + 2 * pad               # rows per image incl. H halo
    M = Nb * Hp                    # stacked matmul M dimension
    WCi, WCm, WCo = W * Cin, W * Cmid, W * Cout

    def stage_with_halo(dst_ref, row_fn):
        # Per-image zero halo rows realise the H padding (W padding is folded
        # into the Toeplitz weights, so there are no lane-offset pads here).
        for n in range(Nb):
            b = n * Hp
            if pad > 0:
                dst_ref[b:b + pad, :] = jnp.zeros((pad, dst_ref.shape[1]),
                                                  dst_ref.dtype)
                dst_ref[b + pad + H:b + Hp, :] = jnp.zeros(
                    (pad, dst_ref.shape[1]), dst_ref.dtype)
            dst_ref[b + pad:b + pad + H, :] = row_fn(n)
        if KH > 1:  # trailing zero rows so the garbage output rows stay in-bounds
            dst_ref[M:M + KH - 1, :] = jnp.zeros((KH - 1, dst_ref.shape[1]),
                                                 dst_ref.dtype)

    def im2col_h(dst_ref, src_ref, wc):
        # KH shifted row-windows laid side by side -> one deep-K matmul.
        for kh in range(KH):
            dst_ref[:, kh * wc:(kh + 1) * wc] = src_ref[kh:kh + M, :]

    def body(x_ref, rhs1_ref, t1_ref, rhs2_ref, t2_ref, o_ref,
             xpad_ref, lhs1_ref, ypad_ref, lhs2_ref, skip_fn):
        # ---- stage input, build im2col LHS ----
        stage_with_halo(xpad_ref, lambda n: x_ref[n])
        im2col_h(lhs1_ref, xpad_ref, WCi)

        # ---- conv1 (BN1 scale folded into weights) + shift + ReLU ----
        y1 = jnp.dot(lhs1_ref[...], rhs1_ref[...], preferred_element_type=f32)
        y1 = jnp.maximum(y1 + t1_ref[...], 0.0)

        # ---- intermediate stays in VMEM; restage with halos for conv2 ----
        stage_with_halo(
            ypad_ref, lambda n: y1[n * Hp:n * Hp + H, :].astype(ypad_ref.dtype))
        im2col_h(lhs2_ref, ypad_ref, WCm)

        # ---- conv2 (BN2 scale folded) + shift (skip bias pre-summed) ----
        y2 = jnp.dot(lhs2_ref[...], rhs2_ref[...], preferred_element_type=f32)
        y2 = y2 + t2_ref[...]

        skip = skip_fn()  # (Nb*H, WCo) f32

        # ---- residual add + ReLU; drop per-image garbage (halo) rows ----
        for n in range(Nb):
            o_ref[n] = jnp.maximum(
                y2[n * Hp:n * Hp + H, :] + skip[n * H:(n + 1) * H, :],
                0.0).astype(o_ref.dtype)

    if has_skip_conv:
        def kernel(x_ref, rhs1_ref, t1_ref, rhs2_ref, t2_ref, wskip_ref,
                   o_ref, xpad_ref, lhs1_ref, ypad_ref, lhs2_ref):
            def skip_fn():
                x_flat = x_ref[...].reshape(Nb * H, WCi)
                return jnp.dot(x_flat, wskip_ref[...],
                               preferred_element_type=f32)
            body(x_ref, rhs1_ref, t1_ref, rhs2_ref, t2_ref, o_ref,
                 xpad_ref, lhs1_ref, ypad_ref, lhs2_ref, skip_fn)
    else:
        def kernel(x_ref, rhs1_ref, t1_ref, rhs2_ref, t2_ref,
                   o_ref, xpad_ref, lhs1_ref, ypad_ref, lhs2_ref):
            def skip_fn():   # nn.Identity skip: plain VPU add, no matmul
                return x_ref[...].reshape(Nb * H, WCi).astype(f32)
            body(x_ref, rhs1_ref, t1_ref, rhs2_ref, t2_ref, o_ref,
                 xpad_ref, lhs1_ref, ypad_ref, lhs2_ref, skip_fn)

    return kernel


# ----------------------------- pallas_call wrapper ---------------------------

def _choose_block_n(N, Hp, target_rows=256):
    # Stack Nb images so Nb*(H+2p) ~ 128..256 rows (M of the matmul), capped
    # to a divisor of N so the grid is exact.
    nb = max(1, min(N, target_rows // max(Hp, 1)))
    while N % nb:
        nb -= 1
    return nb


@functools.partial(jax.jit, static_argnames=("W", "KH", "padding"))
def res_conv_block_forward_slab(x, rhs1, t1, rhs2, t2, wskip, *, W, KH, padding):
    """Fused ResConvBlock on the lane-dense slab layout x: (N, H, W*Cin)."""
    N, H, WCi = x.shape
    Cin = WCi // W
    Cmid = t1.shape[1] // W
    Cout = t2.shape[1] // W
    WCm, WCo = W * Cmid, W * Cout
    Hp = H + 2 * padding
    Nb = _choose_block_n(N, Hp)
    op_dtype = x.dtype
    has_skip_conv = wskip is not None

    kernel = make_res_block_kernel(Nb, H, W, Cin, Cmid, Cout, KH, padding,
                                   has_skip_conv)

    weight_args = (rhs1, t1, rhs2, t2) + ((wskip,) if has_skip_conv else ())
    weight_specs = [
        pl.BlockSpec(rhs1.shape, lambda g: (0, 0)),
        pl.BlockSpec(t1.shape, lambda g: (0, 0)),
        pl.BlockSpec(rhs2.shape, lambda g: (0, 0)),
        pl.BlockSpec(t2.shape, lambda g: (0, 0)),
    ]
    if has_skip_conv:
        weight_specs.append(pl.BlockSpec(wskip.shape, lambda g: (0, 0)))

    out = pl.pallas_call(
        kernel,
        out_shape=jax.ShapeDtypeStruct((N, H, WCo), op_dtype),
        grid_spec=pltpu.PrefetchScalarGridSpec(
            num_scalar_prefetch=0,
            grid=(N // Nb,),
            in_specs=[pl.BlockSpec((Nb, H, WCi), lambda g: (g, 0, 0))]
                     + weight_specs,
            out_specs=pl.BlockSpec((Nb, H, WCo), lambda g: (g, 0, 0)),
            scratch_shapes=[
                pltpu.VMEM((Nb * Hp + KH - 1, WCi), op_dtype),       # x + halos
                pltpu.VMEM((Nb * Hp, KH * WCi), op_dtype),           # im2col LHS 1
                pltpu.VMEM((Nb * Hp + KH - 1, WCm), op_dtype),       # y1 + halos
                pltpu.VMEM((Nb * Hp, KH * WCm), op_dtype),           # im2col LHS 2
            ],
        ),
        compiler_params=pltpu.CompilerParams(
            dimension_semantics=("parallel",)),
    )(x, *weight_args)
    return out


# ----------------------------- one-time host-side prep -----------------------

def _fold_bn(conv_bias, gamma, beta, mean, var, eps):
    scale = gamma / jnp.sqrt(var + eps)
    shift = (conv_bias - mean) * scale + beta
    return scale, shift


def _toeplitz_cat(w_hwio, scale, W, pad):
    """(KH,KW,Ci,Co) conv weight -> (KH*W*Ci, W*Co) concatenated row-band
    Toeplitz matrix (also realizes zero padding along W), with the per-output
    channel BN scale folded into the columns in f32."""
    KH, KW, Ci, Co = w_hwio.shape
    w = w_hwio.astype(jnp.float32) * scale.astype(jnp.float32)
    bands = []
    for kh in range(KH):
        m = jnp.zeros((W * Ci, W * Co), jnp.float32)
        for kw in range(KW):
            diag = jnp.eye(W, k=pad - kw, dtype=jnp.float32)
            m = m + jnp.kron(diag, w[kh, kw])
        bands.append(m)
    return jnp.concatenate(bands, axis=0)


def _tile_cols(v, W):
    # per-channel (C,) -> (1, W*C) matching the flat (H, W*C) layout
    return jnp.tile(v.astype(jnp.float32), W).reshape(1, -1)


def prepare_res_conv_block(p, *, W, padding=1, eps=1e-5,
                           operand_dtype=jnp.float32):
    """One-time per-weight-set prep (BN folding + Toeplitz/kron expansion).
    Call once, reuse for every forward step."""
    KH, KW, Cin, Cout = p["w1"].shape
    assert KH == KW and 2 * padding == KH - 1, "kernel assumes stride-1 'same' convs"

    scale1, shift1 = _fold_bn(p["b1"], p["gamma1"], p["beta1"],
                              p["mean1"], p["var1"], eps)
    scale2, shift2 = _fold_bn(p["b2"], p["gamma2"], p["beta2"],
                              p["mean2"], p["var2"], eps)

    rhs1 = _toeplitz_cat(p["w1"], scale1, W, padding).astype(operand_dtype)
    rhs2 = _toeplitz_cat(p["w2"], scale2, W, padding).astype(operand_dtype)
    t1 = _tile_cols(shift1, W)
    t2 = _tile_cols(shift2, W)

    wskip = None
    if "w_skip" in p:  # 1x1 conv skip (in_ch != out_ch)
        wskip = jnp.kron(jnp.eye(W, dtype=jnp.float32),
                         p["w_skip"].astype(jnp.float32)).astype(operand_dtype)
        t2 = t2 + _tile_cols(p["b_skip"], W)  # fold skip bias into conv2 shift

    return {"rhs1": rhs1, "t1": t1, "rhs2": rhs2, "t2": t2, "wskip": wskip,
            "W": int(W), "KH": int(KH), "padding": int(padding),
            "operand_dtype": operand_dtype}


def res_conv_block_forward(x_nchw, prepared):
    """Model-boundary NCHW wrapper (chained blocks should stay in slab layout
    via res_conv_block_forward_slab instead)."""
    N, Cin, H, W = x_nchw.shape
    assert W == prepared["W"]
    x = jnp.transpose(x_nchw, (0, 2, 3, 1)).reshape(N, H, W * Cin)
    x = x.astype(prepared["operand_dtype"])
    out = res_conv_block_forward_slab(
        x, prepared["rhs1"], prepared["t1"], prepared["rhs2"], prepared["t2"],
        prepared["wskip"], W=prepared["W"], KH=prepared["KH"],
        padding=prepared["padding"])
    Cout = out.shape[-1] // W
    return jnp.transpose(out.reshape(N, H, W, Cout), (0, 3, 1, 2))


# ----------------------------- reference (plain JAX) -------------------------

def reference_forward(x_nchw, p, padding=1, eps=1e-5):
    x = jnp.transpose(x_nchw, (0, 2, 3, 1))
    dn = ("NHWC", "HWIO", "NHWC")

    def conv(h, w, b, pad):
        return jax.lax.conv_general_dilated(
            h, w, (1, 1), [(pad, pad), (pad, pad)], dimension_numbers=dn) + b

    def bn(h, g, b, m, v):
        return (h - m) / jnp.sqrt(v + eps) * g + b

    h = jax.nn.relu(bn(conv(x, p["w1"], p["b1"], padding),
                       p["gamma1"], p["beta1"], p["mean1"], p["var1"]))
    h = bn(conv(h, p["w2"], p["b2"], padding),
           p["gamma2"], p["beta2"], p["mean2"], p["var2"])
    if "w_skip" in p:                      # 1x1 conv skip
        skip = conv(x, p["w_skip"][None, None], p["b_skip"], 0)
    else:                                  # nn.Identity skip
        skip = x
    out = jax.nn.relu(h + skip)
    return jnp.transpose(out, (0, 3, 1, 2))


# ----------------------------- main -------------------------------------------

def make_params(key, in_ch, out_ch, ksize, with_skip):
    ks = jax.random.split(key, 14)
    f32 = jnp.float32
    p = {
        "w1": 0.1 * jax.random.normal(ks[0], (ksize, ksize, in_ch, out_ch), f32),
        "b1": 0.1 * jax.random.normal(ks[1], (out_ch,), f32),
        "gamma1": 1.0 + 0.1 * jax.random.normal(ks[2], (out_ch,), f32),
        "beta1": 0.1 * jax.random.normal(ks[3], (out_ch,), f32),
        "mean1": 0.1 * jax.random.normal(ks[4], (out_ch,), f32),
        "var1": 0.5 + jnp.abs(jax.random.normal(ks[5], (out_ch,), f32)),
        "w2": 0.1 * jax.random.normal(ks[6], (ksize, ksize, out_ch, out_ch), f32),
        "b2": 0.1 * jax.random.normal(ks[7], (out_ch,), f32),
        "gamma2": 1.0 + 0.1 * jax.random.normal(ks[8], (out_ch,), f32),
        "beta2": 0.1 * jax.random.normal(ks[9], (out_ch,), f32),
        "mean2": 0.1 * jax.random.normal(ks[10], (out_ch,), f32),
        "var2": 0.5 + jnp.abs(jax.random.normal(ks[11], (out_ch,), f32)),
    }
    if with_skip:
        p["w_skip"] = 0.1 * jax.random.normal(ks[12], (in_ch, out_ch), f32)
        p["b_skip"] = 0.1 * jax.random.normal(ks[13], (out_ch,), f32)
    return p


if __name__ == "__main__":
    key = jax.random.PRNGKey(0)
    k_p1, k_x1, k_p2, k_x2 = jax.random.split(key, 4)

    in_ch, out_ch, ksize, padding = 4, 8, 3, 1
    N, H, W = 2, 16, 16

    # --- test 1: in_ch != out_ch (1x1 conv skip path), f32 operands ---
    p1 = make_params(k_p1, in_ch, out_ch, ksize, with_skip=True)
    prep1 = prepare_res_conv_block(p1, W=W, padding=padding)     # one-time prep
    x1 = jax.random.normal(k_x1, (N, in_ch, H, W), jnp.float32)  # NCHW
    out1 = jax.block_until_ready(res_conv_block_forward(x1, prep1))
    ref1 = jax.block_until_ready(reference_forward(x1, p1, padding=padding))
    assert out1.shape == (N, out_ch, H, W)
    err1 = float(jnp.max(jnp.abs(out1 - ref1)))
    assert jnp.allclose(out1, ref1, rtol=1e-3, atol=1e-3), \
        f"skip-conv path max abs err {err1}"

    # --- test 2: in_ch == out_ch (nn.Identity skip path), f32 operands ---
    p2 = make_params(k_p2, out_ch, out_ch, ksize, with_skip=False)
    prep2 = prepare_res_conv_block(p2, W=W, padding=padding)
    x2 = jax.random.normal(k_x2, (N, out_ch, H, W), jnp.float32)
    out2 = jax.block_until_ready(res_conv_block_forward(x2, prep2))
    ref2 = jax.block_until_ready(reference_forward(x2, p2, padding=padding))
    assert out2.shape == (N, out_ch, H, W)
    err2 = float(jnp.max(jnp.abs(out2 - ref2)))
    assert jnp.allclose(out2, ref2, rtol=1e-3, atol=1e-3), \
        f"identity-skip path max abs err {err2}"

    # --- test 3: bf16 operands + bf16 output (v5e/v6e fast path), f32 acc ---
    prep1_bf16 = prepare_res_conv_block(p1, W=W, padding=padding,
                                        operand_dtype=jnp.bfloat16)
    out3 = jax.block_until_ready(res_conv_block_forward(x1, prep1_bf16))
    err3 = float(jnp.max(jnp.abs(out3.astype(jnp.float32) - ref1)))
    assert err3 < 0.25, f"bf16 path max abs err {err3}"

    print("KERNEL_OK")
</pallas_src>

<mosaic_0001>
module attributes {stable_mosaic.version = 11 : i64} {
  func.func @kernel(%arg0: i32, %arg1: memref<2x16x64xf32, #tpu.memory_space<vmem>>, %arg2: memref<192x128xf32, #tpu.memory_space<vmem>>, %arg3: memref<1x128xf32, #tpu.memory_space<vmem>>, %arg4: memref<384x128xf32, #tpu.memory_space<vmem>>, %arg5: memref<1x128xf32, #tpu.memory_space<vmem>>, %arg6: memref<64x128xf32, #tpu.memory_space<vmem>>, %arg7: memref<2x16x128xf32, #tpu.memory_space<vmem>>, %arg8: memref<38x64xf32, #tpu.memory_space<vmem>>, %arg9: memref<36x192xf32, #tpu.memory_space<vmem>>, %arg10: memref<38x128xf32, #tpu.memory_space<vmem>>, %arg11: memref<36x384xf32, #tpu.memory_space<vmem>>) attributes {dimension_semantics = [#tpu.dimension_semantics<parallel>], iteration_bounds = array<i64: 1>, scalar_prefetch = 0 : i64, scratch_operands = 4 : i64, tpu.core_type = #tpu.core_type<tc>, window_params = [{transform_indices = @transform_0, window_bounds = array<i64: 2, 16, 64>}, {pipeline_mode = #tpu.pipeline_mode<synchronous>, transform_indices = @transform_1, window_bounds = array<i64: 192, 128>}, {pipeline_mode = #tpu.pipeline_mode<synchronous>, transform_indices = @transform_2, window_bounds = array<i64: 1, 128>}, {pipeline_mode = #tpu.pipeline_mode<synchronous>, transform_indices = @transform_3, window_bounds = array<i64: 384, 128>}, {pipeline_mode = #tpu.pipeline_mode<synchronous>, transform_indices = @transform_4, window_bounds = array<i64: 1, 128>}, {pipeline_mode = #tpu.pipeline_mode<synchronous>, transform_indices = @transform_5, window_bounds = array<i64: 64, 128>}, {transform_indices = @transform_6, window_bounds = array<i64: 2, 16, 128>}]} {
    %cst = arith.constant 0.000000e+00 : f32
    %0 = vector.broadcast %cst : f32 to vector<1x64xf32>
    %c0 = arith.constant 0 : index
    %c0_0 = arith.constant 0 : index
    %1 = vector.load %arg8[%c0, %c0_0] : memref<38x64xf32, #tpu.memory_space<vmem>>, vector<1x64xf32>
    tpu.vector_store %arg8[%c0, %c0_0], %0 {strides = array<i32>} : memref<38x64xf32, #tpu.memory_space<vmem>>, vector<1x64xf32>,
    %cst_1 = arith.constant 0.000000e+00 : f32
    %2 = vector.broadcast %cst_1 : f32 to vector<1x64xf32>
    %c17 = arith.constant 17 : index
    %c0_2 = arith.constant 0 : index
    %3 = vector.load %arg8[%c17, %c0_2] : memref<38x64xf32, #tpu.memory_space<vmem>>, vector<1x64xf32>
    tpu.vector_store %arg8[%c17, %c0_2], %2 {strides = array<i32>} : memref<38x64xf32, #tpu.memory_space<vmem>>, vector<1x64xf32>,
    %c0_3 = arith.constant 0 : index
    %c0_4 = arith.constant 0 : index
    %c0_5 = arith.constant 0 : index
    %4 = vector.load %arg1[%c0_3, %c0_4, %c0_5] : memref<2x16x64xf32, #tpu.memory_space<vmem>>, vector<1x16x64xf32>
    %5 = vector.shape_cast %4 : vector<1x16x64xf32> to vector<16x64xf32>
    %c1 = arith.constant 1 : index
    %c0_6 = arith.constant 0 : index
    %6 = vector.load %arg8[%c1, %c0_6] : memref<38x64xf32, #tpu.memory_space<vmem>>, vector<16x64xf32>
    tpu.vector_store %arg8[%c1, %c0_6], %5 {strides = array<i32>} : memref<38x64xf32, #tpu.memory_space<vmem>>, vector<16x64xf32>,
    %cst_7 = arith.constant 0.000000e+00 : f32
    %7 = vector.broadcast %cst_7 : f32 to vector<1x64xf32>
    %c18 = arith.constant 18 : index
    %c0_8 = arith.constant 0 : index
    %8 = vector.load %arg8[%c18, %c0_8] : memref<38x64xf32, #tpu.memory_space<vmem>>, vector<1x64xf32>
    tpu.vector_store %arg8[%c18, %c0_8], %7 {strides = array<i32>} : memref<38x64xf32, #tpu.memory_space<vmem>>, vector<1x64xf32>,
    %cst_9 = arith.constant 0.000000e+00 : f32
    %9 = vector.broadcast %cst_9 : f32 to vector<1x64xf32>
    %c35 = arith.constant 35 : index
    %c0_10 = arith.constant 0 : index
    %10 = vector.load %arg8[%c35, %c0_10] : memref<38x64xf32, #tpu.memory_space<vmem>>, vector<1x64xf32>
    tpu.vector_store %arg8[%c35, %c0_10], %9 {strides = array<i32>} : memref<38x64xf32, #tpu.memory_space<vmem>>, vector<1x64xf32>,
    %c1_11 = arith.constant 1 : index
    %c0_12 = arith.constant 0 : index
    %c0_13 = arith.constant 0 : index
    %11 = vector.load %arg1[%c1_11, %c0_12, %c0_13] : memref<2x16x64xf32, #tpu.memory_space<vmem>>, vector<1x16x64xf32>
    %12 = vector.shape_cast %11 : vector<1x16x64xf32> to vector<16x64xf32>
    %c19 = arith.constant 19 : index
    %c0_14 = arith.constant 0 : index
    %13 = vector.load %arg8[%c19, %c0_14] : memref<38x64xf32, #tpu.memory_space<vmem>>, vector<16x64xf32>
    tpu.vector_store %arg8[%c19, %c0_14], %12 {strides = array<i32>} : memref<38x64xf32, #tpu.memory_space<vmem>>, vector<16x64xf32>,
    %cst_15 = arith.constant 0.000000e+00 : f32
    %14 = vector.broadcast %cst_15 : f32 to vector<2x64xf32>
    %c36 = arith.constant 36 : index
    %c0_16 = arith.constant 0 : index
    %15 = vector.load %arg8[%c36, %c0_16] : memref<38x64xf32, #tpu.memory_space<vmem>>, vector<2x64xf32>
    tpu.vector_store %arg8[%c36, %c0_16], %14 {strides = array<i32>} : memref<38x64xf32, #tpu.memory_space<vmem>>, vector<2x64xf32>,
    %c0_17 = arith.constant 0 : index
    %c0_18 = arith.constant 0 : index
    %16 = vector.load %arg8[%c0_17, %c0_18] : memref<38x64xf32, #tpu.memory_space<vmem>>, vector<36x64xf32>
    %c0_19 = arith.constant 0 : index
    %c0_20 = arith.constant 0 : index
    %17 = vector.load %arg9[%c0_19, %c0_20] : memref<36x192xf32, #tpu.memory_space<vmem>>, vector<36x64xf32>
    tpu.vector_store %arg9[%c0_19, %c0_20], %16 {strides = array<i32>} : memref<36x192xf32, #tpu.memory_space<vmem>>, vector<36x64xf32>,
    %c1_21 = arith.constant 1 : index
    %c0_22 = arith.constant 0 : index
    %18 = vector.load %arg8[%c1_21, %c0_22] : memref<38x64xf32, #tpu.memory_space<vmem>>, vector<36x64xf32>
    %c0_23 = arith.constant 0 : index
    %c64 = arith.constant 64 : index
    %19 = vector.load %arg9[%c0_23, %c64] : memref<36x192xf32, #tpu.memory_space<vmem>>, vector<36x64xf32>
    tpu.vector_store %arg9[%c0_23, %c64], %18 {strides = array<i32>} : memref<36x192xf32, #tpu.memory_space<vmem>>, vector<36x64xf32>,
    %c2 = arith.constant 2 : index
    %c0_24 = arith.constant 0 : index
    %20 = vector.load %arg8[%c2, %c0_24] : memref<38x64xf32, #tpu.memory_space<vmem>>, vector<36x64xf32>
    %c0_25 = arith.constant 0 : index
    %c128 = arith.constant 128 : index
    %21 = vector.load %arg9[%c0_25, %c128] : memref<36x192xf32, #tpu.memory_space<vmem>>, vector<36x64xf32>
    tpu.vector_store %arg9[%c0_25, %c128], %20 {strides = array<i32>} : memref<36x192xf32, #tpu.memory_space<vmem>>, vector<36x64xf32>,
    %c0_26 = arith.constant 0 : index
    %c0_27 = arith.constant 0 : index
    %22 = vector.load %arg9[%c0_26, %c0_27] : memref<36x192xf32, #tpu.memory_space<vmem>>, vector<36x192xf32>
    %c0_28 = arith.constant 0 : index
    %c0_29 = arith.constant 0 : index
    %23 = vector.load %arg2[%c0_28, %c0_29] : memref<192x128xf32, #tpu.memory_space<vmem>>, vector<192x128xf32>
    %cst_30 = arith.constant dense<0.000000e+00> : vector<36x128xf32>
    %24 = tpu.matmul %22, %23, %cst_30 {dimension_numbers = #tpu.dot_dimension_numbers<[1], [0], [0], [1], [0, 0, 1, 1], [], []>} : vector<36x192xf32>, vector<192x128xf32>, vector<36x128xf32> -> vector<36x128xf32>
    %c0_31 = arith.constant 0 : index
    %c0_32 = arith.constant 0 : index
    %25 = vector.load %arg3[%c0_31, %c0_32] : memref<1x128xf32, #tpu.memory_space<vmem>>, vector<1x128xf32>
    %26 = vector.broadcast %25 : vector<1x128xf32> to vector<36x128xf32>
    %27 = arith.addf %24, %26 : vector<36x128xf32>
    %cst_33 = arith.constant 0.000000e+00 : f32
    %28 = vector.broadcast %cst_33 : f32 to vector<36x128xf32>
    %29 = arith.maximumf %27, %28 : vector<36x128xf32>
    %cst_34 = arith.constant 0.000000e+00 : f32
    %30 = vector.broadcast %cst_34 : f32 to vector<1x128xf32>
    %c0_35 = arith.constant 0 : index
    %c0_36 = arith.constant 0 : index
    %31 = vector.load %arg10[%c0_35, %c0_36] : memref<38x128xf32, #tpu.memory_space<vmem>>, vector<1x128xf32>
    tpu.vector_store %arg10[%c0_35, %c0_36], %30 {strides = array<i32>} : memref<38x128xf32, #tpu.memory_space<vmem>>, vector<1x128xf32>,
    %cst_37 = arith.constant 0.000000e+00 : f32
    %32 = vector.broadcast %cst_37 : f32 to vector<1x128xf32>
    %c17_38 = arith.constant 17 : index
    %c0_39 = arith.constant 0 : index
    %33 = vector.load %arg10[%c17_38, %c0_39] : memref<38x128xf32, #tpu.memory_space<vmem>>, vector<1x128xf32>
    tpu.vector_store %arg10[%c17_38, %c0_39], %32 {strides = array<i32>} : memref<38x128xf32, #tpu.memory_space<vmem>>, vector<1x128xf32>,
    %34 = vector.extract_strided_slice %29 {offsets = [0, 0], sizes = [16, 128], strides = [1, 1]} : vector<36x128xf32> to vector<16x128xf32>
    %c1_40 = arith.constant 1 : index
    %c0_41 = arith.constant 0 : index
    %35 = vector.load %arg10[%c1_40, %c0_41] : memref<38x128xf32, #tpu.memory_space<vmem>>, vector<16x128xf32>
    tpu.vector_store %arg10[%c1_40, %c0_41], %34 {strides = array<i32>} : memref<38x128xf32, #tpu.memory_space<vmem>>, vector<16x128xf32>,
    %cst_42 = arith.constant 0.000000e+00 : f32
    %36 = vector.broadcast %cst_42 : f32 to vector<1x128xf32>
    %c18_43 = arith.constant 18 : index
    %c0_44 = arith.constant 0 : index
    %37 = vector.load %arg10[%c18_43, %c0_44] : memref<38x128xf32, #tpu.memory_space<vmem>>, vector<1x128xf32>
    tpu.vector_store %arg10[%c18_43, %c0_44], %36 {strides = array<i32>} : memref<38x128xf32, #tpu.memory_space<vmem>>, vector<1x128xf32>,
    %cst_45 = arith.constant 0.000000e+00 : f32
    %38 = vector.broadcast %cst_45 : f32 to vector<1x128xf32>
    %c35_46 = arith.constant 35 : index
    %c0_47 = arith.constant 0 : index
    %39 = vector.load %arg10[%c35_46, %c0_47] : memref<38x128xf32, #tpu.memory_space<vmem>>, vector<1x128xf32>
    tpu.vector_store %arg10[%c35_46, %c0_47], %38 {strides = array<i32>} : memref<38x128xf32, #tpu.memory_space<vmem>>, vector<1x128xf32>,
    %40 = vector.extract_strided_slice %29 {offsets = [18, 0], sizes = [16, 128], strides = [1, 1]} : vector<36x128xf32> to vector<16x128xf32>
    %c19_48 = arith.constant 19 : index
    %c0_49 = arith.constant 0 : index
    %41 = vector.load %arg10[%c19_48, %c0_49] : memref<38x128xf32, #tpu.memory_space<vmem>>, vector<16x128xf32>
    tpu.vector_store %arg10[%c19_48, %c0_49], %40 {strides = array<i32>} : memref<38x128xf32, #tpu.memory_space<vmem>>, vector<16x128xf32>,
    %cst_50 = arith.constant 0.000000e+00 : f32
    %42 = vector.broadcast %cst_50 : f32 to vector<2x128xf32>
    %c36_51 = arith.constant 36 : index
    %c0_52 = arith.constant 0 : index
    %43 = vector.load %arg10[%c36_51, %c0_52] : memref<38x128xf32, #tpu.memory_space<vmem>>, vector<2x128xf32>
    tpu.vector_store %arg10[%c36_51, %c0_52], %42 {strides = array<i32>} : memref<38x128xf32, #tpu.memory_space<vmem>>, vector<2x128xf32>,
    %c0_53 = arith.constant 0 : index
    %c0_54 = arith.constant 0 : index
    %44 = vector.load %arg10[%c0_53, %c0_54] : memref<38x128xf32, #tpu.memory_space<vmem>>, vector<36x128xf32>
    %c0_55 = arith.constant 0 : index
    %c0_56 = arith.constant 0 : index
    %45 = vector.load %arg11[%c0_55, %c0_56] : memref<36x384xf32, #tpu.memory_space<vmem>>, vector<36x128xf32>
    tpu.vector_store %arg11[%c0_55, %c0_56], %44 {strides = array<i32>} : memref<36x384xf32, #tpu.memory_space<vmem>>, vector<36x128xf32>,
    %c1_57 = arith.constant 1 : index
    %c0_58 = arith.constant 0 : index
    %46 = vector.load %arg10[%c1_57, %c0_58] : memref<38x128xf32, #tpu.memory_space<vmem>>, vector<36x128xf32>
    %c0_59 = arith.constant 0 : index
    %c128_60 = arith.constant 128 : index
    %47 = vector.load %arg11[%c0_59, %c128_60] : memref<36x384xf32, #tpu.memory_space<vmem>>, vector<36x128xf32>
    tpu.vector_store %arg11[%c0_59, %c128_60], %46 {strides = array<i32>} : memref<36x384xf32, #tpu.memory_space<vmem>>, vector<36x128xf32>,
    %c2_61 = arith.constant 2 : index
    %c0_62 = arith.constant 0 : index
    %48 = vector.load %arg10[%c2_61, %c0_62] : memref<38x128xf32, #tpu.memory_space<vmem>>, vector<36x128xf32>
    %c0_63 = arith.constant 0 : index
    %c256 = arith.constant 256 : index
    %49 = vector.load %arg11[%c0_63, %c256] : memref<36x384xf32, #tpu.memory_space<vmem>>, vector<36x128xf32>
    tpu.vector_store %arg11[%c0_63, %c256], %48 {strides = array<i32>} : memref<36x384xf32, #tpu.memory_space<vmem>>, vector<36x128xf32>,
    %c0_64 = arith.constant 0 : index
    %c0_65 = arith.constant 0 : index
    %50 = vector.load %arg11[%c0_64, %c0_65] : memref<36x384xf32, #tpu.memory_space<vmem>>, vector<36x384xf32>
    %c0_66 = arith.constant 0 : index
    %c0_67 = arith.constant 0 : index
    %51 = vector.load %arg4[%c0_66, %c0_67] : memref<384x128xf32, #tpu.memory_space<vmem>>, vector<384x128xf32>
    %cst_68 = arith.constant dense<0.000000e+00> : vector<36x128xf32>
    %52 = tpu.matmul %50, %51, %cst_68 {dimension_numbers = #tpu.dot_dimension_numbers<[1], [0], [0], [1], [0, 0, 1, 1], [], []>} : vector<36x384xf32>, vector<384x128xf32>, vector<36x128xf32> -> vector<36x128xf32>
    %c0_69 = arith.constant 0 : index
    %c0_70 = arith.constant 0 : index
    %53 = vector.load %arg5[%c0_69, %c0_70] : memref<1x128xf32, #tpu.memory_space<vmem>>, vector<1x128xf32>
    %54 = vector.broadcast %53 : vector<1x128xf32> to vector<36x128xf32>
    %55 = arith.addf %52, %54 : vector<36x128xf32>
    %c0_71 = arith.constant 0 : index
    %c0_72 = arith.constant 0 : index
    %c0_73 = arith.constant 0 : index
    %56 = vector.load %arg1[%c0_71, %c0_72, %c0_73] : memref<2x16x64xf32, #tpu.memory_space<vmem>>, vector<2x16x64xf32>
    %57 = vector.shape_cast %56 : vector<2x16x64xf32> to vector<32x64xf32>
    %c0_74 = arith.constant 0 : index
    %c0_75 = arith.constant 0 : index
    %58 = vector.load %arg6[%c0_74, %c0_75] : memref<64x128xf32, #tpu.memory_space<vmem>>, vector<64x128xf32>
    %cst_76 = arith.constant dense<0.000000e+00> : vector<32x128xf32>
    %59 = tpu.matmul %57, %58, %cst_76 {dimension_numbers = #tpu.dot_dimension_numbers<[1], [0], [0], [1], [0, 0, 1, 1], [], []>} : vector<32x64xf32>, vector<64x128xf32>, vector<32x128xf32> -> vector<32x128xf32>
    %60 = vector.extract_strided_slice %55 {offsets = [0, 0], sizes = [16, 128], strides = [1, 1]} : vector<36x128xf32> to vector<16x128xf32>
    %61 = vector.extract_strided_slice %59 {offsets = [0, 0], sizes = [16, 128], strides = [1, 1]} : vector<32x128xf32> to vector<16x128xf32>
    %62 = arith.addf %60, %61 : vector<16x128xf32>
    %cst_77 = arith.constant 0.000000e+00 : f32
    %63 = vector.broadcast %cst_77 : f32 to vector<16x128xf32>
    %64 = arith.maximumf %62, %63 : vector<16x128xf32>
    %c0_78 = arith.constant 0 : index
    %c0_79 = arith.constant 0 : index
    %c0_80 = arith.constant 0 : index
    %65 = vector.load %arg7[%c0_78, %c0_79, %c0_80] : memref<2x16x128xf32, #tpu.memory_space<vmem>>, vector<1x16x128xf32>
    %66 = vector.shape_cast %65 : vector<1x16x128xf32> to vector<16x128xf32>
    %67 = vector.shape_cast %64 : vector<16x128xf32> to vector<1x16x128xf32>
    tpu.vector_store %arg7[%c0_78, %c0_79, %c0_80], %67 {strides = array<i32>} : memref<2x16x128xf32, #tpu.memory_space<vmem>>, vector<1x16x128xf32>,
    %68 = vector.extract_strided_slice %55 {offsets = [18, 0], sizes = [16, 128], strides = [1, 1]} : vector<36x128xf32> to vector<16x128xf32>
    %69 = vector.extract_strided_slice %59 {offsets = [16, 0], sizes = [16, 128], strides = [1, 1]} : vector<32x128xf32> to vector<16x128xf32>
    %70 = arith.addf %68, %69 : vector<16x128xf32>
    %cst_81 = arith.constant 0.000000e+00 : f32
    %71 = vector.broadcast %cst_81 : f32 to vector<16x128xf32>
    %72 = arith.maximumf %70, %71 : vector<16x128xf32>
    %c1_82 = arith.constant 1 : index
    %c0_83 = arith.constant 0 : index
    %c0_84 = arith.constant 0 : index
    %73 = vector.load %arg7[%c1_82, %c0_83, %c0_84] : memref<2x16x128xf32, #tpu.memory_space<vmem>>, vector<1x16x128xf32>
    %74 = vector.shape_cast %73 : vector<1x16x128xf32> to vector<16x128xf32>
    %75 = vector.shape_cast %72 : vector<16x128xf32> to vector<1x16x128xf32>
    tpu.vector_store %arg7[%c1_82, %c0_83, %c0_84], %75 {strides = array<i32>} : memref<2x16x128xf32, #tpu.memory_space<vmem>>, vector<1x16x128xf32>,
    return
  }
  func.func @transform_0(%arg0: i32) -> (i32, i32, i32) {
    %c0_i32 = arith.constant 0 : i32
    %c0_i32_0 = arith.constant 0 : i32
    %c0_i32_1 = arith.constant 0 : i32
    return %arg0, %c0_i32, %c0_i32_0 : i32, i32, i32
  }
  func.func @transform_1(%arg0: i32) -> (i32, i32) {
    %c0_i32 = arith.constant 0 : i32
    %c0_i32_0 = arith.constant 0 : i32
    %c0_i32_1 = arith.constant 0 : i32
    return %c0_i32, %c0_i32_0 : i32, i32
  }
  func.func @transform_2(%arg0: i32) -> (i32, i32) {
    %c0_i32 = arith.constant 0 : i32
    %c0_i32_0 = arith.constant 0 : i32
    %c0_i32_1 = arith.constant 0 : i32
    return %c0_i32, %c0_i32_0 : i32, i32
  }
  func.func @transform_3(%arg0: i32) -> (i32, i32) {
    %c0_i32 = arith.constant 0 : i32
    %c0_i32_0 = arith.constant 0 : i32
    %c0_i32_1 = arith.constant 0 : i32
    return %c0_i32, %c0_i32_0 : i32, i32
  }
  func.func @transform_4(%arg0: i32) -> (i32, i32) {
    %c0_i32 = arith.constant 0 : i32
    %c0_i32_0 = arith.constant 0 : i32
    %c0_i32_1 = arith.constant 0 : i32
    return %c0_i32, %c0_i32_0 : i32, i32
  }
  func.func @transform_5(%arg0: i32) -> (i32, i32) {
    %c0_i32 = arith.constant 0 : i32
    %c0_i32_0 = arith.constant 0 : i32
    %c0_i32_1 = arith.constant 0 : i32
    return %c0_i32, %c0_i32_0 : i32, i32
  }
  func.func @transform_6(%arg0: i32) -> (i32, i32, i32) {
    %c0_i32 = arith.constant 0 : i32
    %c0_i32_0 = arith.constant 0 : i32
    %c0_i32_1 = arith.constant 0 : i32
    return %arg0, %c0_i32, %c0_i32_0 : i32, i32, i32
  }
}

</mosaic_0001>

<bundles_post_ra>
// kernel: res_conv_block_forward_slab.1
= control target key start
LH: loop header
LB: loop body
LE: loop exit
PB: predicated region body
PF: predicated region fallthrough
CT: control target
= control target key end

     0   :  { %11 = vsyncpa [#allocation7], 0  ;;  %s1212_s0 = inlined_call_operand.hbm [shape: f32[2,16,64], index: 0, kind: input, shape index: {}]   ;;  %s1213_s1 = inlined_call_operand.hbm [shape: f32[192,128], index: 1, kind: input, shape index: {}]   ;;  %s1214_s2 = inlined_call_operand.vmem [shape: f32[1,128], index: 2, kind: input, shape index: {}]   ;;  %s1215_s3 = inlined_call_operand.hbm [shape: f32[384,128], index: 3, kind: input, shape index: {}]   ;;  %s1216_s4 = inlined_call_operand.vmem [shape: f32[1,128], index: 4, kind: input, shape index: {}]   ;;  %s1217_s5 = inlined_call_operand.hbm [shape: f32[64,128], index: 5, kind: input, shape index: {}]   ;;  %s1218_s6 = inlined_call_operand.hbm [shape: f32[2,16,128], index: 6, kind: output, shape index: {}]  }
   0x1   :  { %12 = vsyncpa [#allocation10], 0 }
   0x2   :  { %13 = vsyncpa [#allocation13], 0 }
   0x3   :  { %14 = vsyncpa [#allocation8], 0  ;;  %s1021_s21 = smov [#allocation9]   ;;  %s1022_s23 = smov [#allocation6]  }
   0x4   :  { %s32_s22 = sshll.u32 %s1021_s21, 4  ;;  %s20_s24 = sshll.u32 %s1022_s23, 4  ;;  %s33_s22 = int_to_ptr.vmem [resolvable:$true] %s32_s22  ;;  %s21_s24 = int_to_ptr.vmem [resolvable:$true] %s20_s24 }
   0x5   :  { %s921_s25 = scalar_lea.vmem %s33_s22, 3072  ;;  %p926_p1 = scmp.lt.s32.totalorder %s33_s22, %s33_s22 }
   0x6   :  { %p922_p0 = scmp.ne.s32.totalorder %s33_s22, %s921_s25  ;;  %p927_p2 = scmp.lt.s32.totalorder %s921_s25, %s921_s25 }
   0x8   :  { %p928_p3 = por %p927_p2, %p926_p1 }
   0xa   :  { %p929_p4 = pnand %p928_p3, %p922_p0 }
   0xc   :  { %932 = shalt.err (!%p929_p4)
}
   0xd   :  { %s1023_s26 = smov 128   ;;  %s1024_s27 = smov 8  }
   0xe   :  { %38 = dma.hbm_to_vmem [thread:$0]  %s1213_s1, 3072, %s33_s22, [#allocation10], %s1023_s26, %s1023_s26, %s1024_s27  }
   0xf   :  { %s941_s30 = scalar_lea.vmem %s21_s24, 512  ;;  %p946_p6 = scmp.lt.s32.totalorder %s21_s24, %s21_s24 }
  0x10   :  { %p942_p5 = scmp.ne.s32.totalorder %s21_s24, %s941_s30  ;;  %p947_p7 = scmp.lt.s32.totalorder %s941_s30, %s941_s30 }
  0x12   :  { %p948_p8 = por %p947_p7, %p946_p6 }
  0x14   :  { %p949_p9 = pnand %p948_p8, %p942_p5 }
  0x16   :  { %952 = shalt.err (!%p949_p9)
}
  0x17   :  { %26 = dma.hbm_to_vmem [thread:$0]  %s1212_s0, 512, %s21_s24, [#allocation7], %s1023_s26, %s1023_s26, %s1024_s27  }
  0x18   :  { %s1025_s9 = smov [#allocation11]   ;;  %s1026_s11 = smov [#allocation12]  }
  0x19   :  { %s46_s10 = sshll.u32 %s1025_s9, 4  ;;  %s60_s12 = sshll.u32 %s1026_s11, 4  ;;  %s47_s10 = int_to_ptr.vmem [resolvable:$true] %s46_s10  ;;  %s61_s12 = int_to_ptr.vmem [resolvable:$true] %s60_s12 }
  0x1a   :  { %s961_s1 = scalar_lea.vmem %s47_s10, 6144  ;;  %p966_p11 = scmp.lt.s32.totalorder %s47_s10, %s47_s10 }
  0x1b   :  { %p962_p10 = scmp.ne.s32.totalorder %s47_s10, %s961_s1  ;;  %p967_p12 = scmp.lt.s32.totalorder %s961_s1, %s961_s1 }
  0x1d   :  { %p968_p13 = por %p967_p12, %p966_p11 }
  0x1f   :  { %p969_p0 = pnand %p968_p13, %p962_p10 }
  0x21   :  { %972 = shalt.err (!%p969_p0)
}
  0x22   :  { %52 = dma.hbm_to_vmem [thread:$0]  %s1215_s3, 6144, %s47_s10, [#allocation10], %s1023_s26, %s1023_s26, %s1024_s27  }
  0x23   :  { %s981_s0 = scalar_lea.vmem %s61_s12, 1024  ;;  %p986_p2 = scmp.lt.s32.totalorder %s61_s12, %s61_s12 }
  0x24   :  { %p982_p1 = scmp.ne.s32.totalorder %s61_s12, %s981_s0  ;;  %p987_p3 = scmp.lt.s32.totalorder %s981_s0, %s981_s0 }
  0x26   :  { %p988_p4 = por %p987_p3, %p986_p2 }
  0x28   :  { %p989_p5 = pnand %p988_p4, %p982_p1 }
  0x2a   :  { %992 = shalt.err (!%p989_p5)
}
  0x2b   :  { %66 = dma.hbm_to_vmem [thread:$0]  %s1217_s5, 1024, %s61_s12, [#allocation13], %s1023_s26, %s1023_s26, %s1024_s27  }
  0x2c   :  { %1013 = dma.done.wait [#allocation7], 512  }
  0x2d   :  { %1014 = vsyncadd [#allocation7], 4294966784 }
  0x2e   :  { %1015 = dma.done.wait [#allocation10], 9216  }
  0x2f   :  { %1016 = vsyncadd [#allocation10], 4294958080 }
  0x30   :  { %1017 = dma.done.wait [#allocation13], 1024  }
  0x31   :  { %1018 = vsyncadd [#allocation13], 4294966272  ;;  %vm79_vm0 = vcmask 516096   ;;  %v1027_v0 = vmov 0.0   ;;  %vm94_vm1 = vcmask 517120   ;;  %vm84_vm2 = vcmask 523264  }
  0x32   :  { %81 = vst.msk [vmem:[#allocation2 + $0x11] sm:$0x1] %vm79_vm0, %v1027_v0  ;;  %87 = vst.msk [vmem:[#allocation2 + $0x12] sm:$0x1] %vm79_vm0, %v1027_v0  ;;  %205 = vmatprep.subr.mxu0 %v1027_v0  ;;  %v1101_v1 = vld [vmem:[#allocation6] sm:$0xff]  ;;  %v1103_v2 = vld [vmem:[#allocation6 + $0x8] sm:$0xff] }
  0x33   :  { %80 = vst.msk [vmem:[#allocation2] sm:$0x1] %vm79_vm0, %v1027_v0  ;;  %88 = vst.msk [vmem:[#allocation2 + $0x23] sm:$0x1] %vm79_vm0, %v1027_v0  ;;  %v1105_v3 = vld [vmem:[#allocation6 + $0x10] sm:$0xff]  ;;  %v1113_v4 = vld [vmem:[#allocation6 + $0x18] sm:$0xff] }
  0x34   :  { %300 = vst [vmem:[#allocation4] sm:$0x1] %v1027_v0  ;;  %301 = vst [vmem:[#allocation4 + $0x11] sm:$0x1] %v1027_v0  ;;  %v174_v5 = vld [vmem:[#allocation9 + $0x78] sm:$0xff]  ;;  %v173_v6 = vld [vmem:[#allocation9 + $0x70] sm:$0xff] }
  0x35   :  { %304 = vst [vmem:[#allocation4 + $0x12] sm:$0x1] %v1027_v0  ;;  %305 = vst [vmem:[#allocation4 + $0x23] sm:$0x1] %v1027_v0  ;;  %206 = vmatpush1.msra.mxu0 %v174_v5  ;;  %v172_v7 = vld [vmem:[#allocation9 + $0x68] sm:$0xff]  ;;  %v171_v8 = vld [vmem:[#allocation9 + $0x60] sm:$0xff] }
  0x36   :  { %309 = vst [vmem:[#allocation4 + $0x24] sm:$0x3] %v1027_v0  ;;  %95 = vst.msk [vmem:[#allocation2 + $0x24] sm:$0x3] %vm94_vm1, %v1027_v0  ;;  %207 = vmatprep.subr.mxu0 %v1027_v0  ;;  %v170_v11 = vld [vmem:[#allocation9 + $0x58] sm:$0xff]  ;;  %s1028_s3 = smov 64  }
  0x37   :  { %85 = vst.msk [vmem:[#allocation2 + $0x1] sm:$0xff] %vm84_vm2, %v1101_v1  ;;  %86 = vst.msk [vmem:[#allocation2 + $0x9] sm:$0xff] %vm84_vm2, %v1103_v2  ;;  %208 = vmatpush1.msra.mxu0 %v173_v6  ;;  %v169_v16 = vld [vmem:[#allocation9 + $0x50] sm:$0xff]  ;;  %v168_v17 = vld [vmem:[#allocation9 + $0x48] sm:$0xff]  ;;  %vm105_vm3 = vcmask 519168   ;;  %vm132_vm4 = vcmask 1048064  }
  0x38   :  { %92 = vst.msk [vmem:[#allocation2 + $0x13] sm:$0xff] %vm84_vm2, %v1105_v3  ;;  %93 = vst.msk [vmem:[#allocation2 + $0x1b] sm:$0xff] %vm84_vm2, %v1113_v4  ;;  %209 = vmatprep.subr.mxu0 %v1027_v0  ;;  %v167_v27 = vld [vmem:[#allocation9 + $0x40] sm:$0xff]  ;;  %v166_v28 = vld [vmem:[#allocation9 + $0x38] sm:$0xff]  ;;  %vm137_vm5 = vcmask 1043968   ;;  %vm1029_vm6 = vmmov 0  }
  0x39   :  { %210 = vmatpush1.msra.mxu0 %v172_v7  ;;  %v165_v29 = vld [vmem:[#allocation9 + $0x30] sm:$0xff]  ;;  %v386_v31 = vld [vmem:[#allocation11 + $0xf8] sm:$0xff]  ;;  %v164_v33 = vld [vmem:[#allocation9 + $0x28] sm:$0xff]  ;;  %vm707_vm7 = vcmask 1041408  }
  0x3a   :  { %211 = vmatprep.subr.mxu0 %v1027_v0  ;;  %v370_v32 = vld [vmem:[#allocation11 + $0x78] sm:$0xff]  ;;  %754 = vmatprep.subr.mxu1 %v386_v31  ;;  %v385_v34 = vld [vmem:[#allocation11 + $0xf0] sm:$0xff]  ;;  %v384_v36 = vld [vmem:[#allocation11 + $0xe8] sm:$0xff] }
  0x3b   :  { %212 = vmatpush1.msra.mxu0 %v171_v8  ;;  %755 = vmatpush3.msra.mxu1 %v370_v32  ;;  %v369_v35 = vld [vmem:[#allocation11 + $0x70] sm:$0xff]  ;;  %v163_v37 = vld [vmem:[#allocation9 + $0x20] sm:$0xff]  ;;  %v368_v38 = vld [vmem:[#allocation11 + $0x68] sm:$0xff] }
  0x3c   :  { %213 = vmatprep.subr.mxu0 %v1027_v0  ;;  %756 = vmatprep.subr.mxu1 %v385_v34  ;;  %v383_v39 = vld [vmem:[#allocation11 + $0xe0] sm:$0xff]  ;;  %v162_v40 = vld [vmem:[#allocation9 + $0x18] sm:$0xff]  ;;  %v161_v43 = vld [vmem:[#allocation9 + $0x10] sm:$0xff] }
  0x3d   :  { %214 = vmatpush1.msra.mxu0 %v170_v11  ;;  %757 = vmatpush3.msra.mxu1 %v369_v35  ;;  %v367_v41 = vld [vmem:[#allocation11 + $0x60] sm:$0xff]  ;;  %v382_v42 = vld [vmem:[#allocation11 + $0xd8] sm:$0xff]  ;;  %v381_v45 = vld [vmem:[#allocation11 + $0xd0] sm:$0xff] }
  0x3e   :  { %v107_v9 = vld [vmem:[#allocation2 + $0x1] sm:$0xff]  ;;  %v108_v13 = vld [vmem:[#allocation2 + $0x9] sm:$0xff]  ;;  %215 = vmatprep.subr.mxu0 %v1027_v0  ;;  %758 = vmatprep.subr.mxu1 %v384_v36  ;;  %v159_v47 = vld [vmem:[#allocation9] sm:$0xff] }
  0x3f   :  { %v109_v10 = vld [vmem:[#allocation2 + $0x11] sm:$0xff]  ;;  %117 = vrot.lane.b32.xlu0 %v107_v9, %s1028_s3  ;;  %v96_v12 = vld [vmem:[#allocation2] sm:$0xff]  ;;  %v97_v15 = vld [vmem:[#allocation2 + $0x8] sm:$0xff]  ;;  %216 = vmatpush1.msra.mxu0 %v169_v16 }
  0x40   :  { %121 = vrot.lane.b32.xlu1 %v109_v10, %s1028_s3  ;;  %v110_v14 = vld [vmem:[#allocation2 + $0x19] sm:$0xff]  ;;  %101 = vst.msk [vmem:[#allocation3] sm:$0xff] %vm84_vm2, %v96_v12  ;;  %102 = vst.msk [vmem:[#allocation3 + $0x10] sm:$0xff] %vm84_vm2, %v97_v15  ;;  %v139_v18 = vld [vmem:[#allocation2 + $0x2] sm:$0xff]  ;;  %217 = vmatprep.subr.mxu0 %v1027_v0 }
  0x41   :  { %144 = vst.msk [vmem:[#allocation3 + $0x8] sm:$0xff] %vm84_vm2, %v139_v18  ;;  %v98_v19 = vld [vmem:[#allocation2 + $0x10] sm:$0xff]  ;;  %v99_v21 = vld [vmem:[#allocation2 + $0x18] sm:$0xff]  ;;  %v100_v22 = vld [vmem:[#allocation2 + $0x20] sm:$0xf]  ;;  %218 = vmatpush1.msra.mxu0 %v168_v17  ;;  %759 = vmatpush3.msra.mxu1 %v368_v38 }
  0x42   :  { %v140_v20 = vld [vmem:[#allocation2 + $0xa] sm:$0xff]  ;;  %103 = vst.msk [vmem:[#allocation3 + $0x20] sm:$0xff] %vm84_vm2, %v98_v19  ;;  %104 = vst.msk [vmem:[#allocation3 + $0x30] sm:$0xff] %vm84_vm2, %v99_v21  ;;  %v143_v23 = vld [vmem:[#allocation2 + $0x22] sm:$0xf]  ;;  %219 = vmatprep.subr.mxu0 %v1027_v0  ;;  %760 = vmatprep.subr.mxu1 %v383_v39 }
  0x43   :  { %119 = vrot.lane.b32.xlu0 %v108_v13, %s1028_s3  ;;  %145 = vst.msk [vmem:[#allocation3 + $0x18] sm:$0xff] %vm84_vm2, %v140_v20  ;;  %v141_v24 = vld [vmem:[#allocation2 + $0x12] sm:$0xff]  ;;  %v111_v25 = vld [vmem:[#allocation2 + $0x21] sm:$0xf]  ;;  %220 = vmatpush1.msra.mxu0 %v167_v27  ;;  %v181_v49 = vld [vmem:[#allocation9 + $0xb0] sm:$0xff] }
  0x44   :  { %123 = vrot.lane.b32.xlu1 %v110_v14, %s1028_s3  ;;  %106 = vst.msk [vmem:[#allocation3 + $0x40] sm:$0xf] %vm105_vm3, %v100_v22  ;;  %148 = vst.msk [vmem:[#allocation3 + $0x48] sm:$0xf] %vm105_vm3, %v143_v23  ;;  %v142_v26 = vld [vmem:[#allocation2 + $0x1a] sm:$0xff]  ;;  %221 = vmatprep.subr.mxu0 %v1027_v0  ;;  %v366_v44 = vld [vmem:[#allocation11 + $0x58] sm:$0xff] }
  0x45   :  { %146 = vst.msk [vmem:[#allocation3 + $0x28] sm:$0xff] %vm84_vm2, %v141_v24  ;;  %147 = vst.msk [vmem:[#allocation3 + $0x38] sm:$0xff] %vm84_vm2, %v142_v26  ;;  %222 = vmatpush1.msra.mxu0 %v166_v28  ;;  %761 = vmatpush3.msra.mxu1 %v367_v41  ;;  %v160_v46 = vld [vmem:[#allocation9 + $0x8] sm:$0xff]  ;;  %v182_v48 = vld [vmem:[#allocation9 + $0xb8] sm:$0xff] }
  0x46   :  { %223 = vmatprep.subr.mxu0 %v1027_v0  ;;  %762 = vmatprep.subr.mxu1 %v382_v42  ;;  %v180_v50 = vld [vmem:[#allocation9 + $0xa8] sm:$0xff]  ;;  %v179_v51 = vld [vmem:[#allocation9 + $0xa0] sm:$0xff]  ;;  %v178_v52 = vld [vmem:[#allocation9 + $0x98] sm:$0xff] }
  0x47   :  { %125 = vrot.lane.b32.xlu0 %v111_v25, %s1028_s3  ;;  %224 = vmatpush1.msra.mxu0 %v165_v29  ;;  %v177_v53 = vld [vmem:[#allocation9 + $0x90] sm:$0xff]  ;;  %v176_v54 = vld [vmem:[#allocation9 + $0x88] sm:$0xff]  ;;  %v175_v55 = vld [vmem:[#allocation9 + $0x80] sm:$0xff] }
  0x48   :  { %v150_v30 = vld [vmem:[#allocation3 + $0x8] sm:$0xff]  ;;  %225 = vmatprep.subr.mxu0 %v1027_v0  ;;  %763 = vmatpush3.msra.mxu1 %v366_v44  ;;  %v365_v11 = vld [vmem:[#allocation11 + $0x50] sm:$0xff]  ;;  %v380_v12 = vld [vmem:[#allocation11 + $0xc8] sm:$0xff] }
  0x49   :  { %744 = vmatprep.mubr.msk.f32.mxu0 %vm84_vm2, %v150_v30  ;;  %226 = vmatpush1.msra.mxu0 %v164_v33  ;;  %v364_v13 = vld [vmem:[#allocation11 + $0x48] sm:$0xff]  ;;  %v379_v14 = vld [vmem:[#allocation11 + $0xc0] sm:$0xff]  ;;  %v378_v16 = vld [vmem:[#allocation11 + $0xb8] sm:$0xff] }
  0x4a   :  { %227 = vmatprep.subr.mxu0 %v1027_v0  ;;  %764 = vmatprep.subr.mxu1 %v381_v45  ;;  %v152_v60 = vld [vmem:[#allocation3 + $0x18] sm:$0xff]  ;;  %v363_v15 = vld [vmem:[#allocation11 + $0x40] sm:$0xff]  ;;  %v362_v17 = vld [vmem:[#allocation11 + $0x38] sm:$0xff] }
  0x4b   :  { %228 = vmatpush1.msra.mxu0 %v163_v37  ;;  %v158_v9 = vld [vmem:[#allocation3 + $0x48] sm:$0xf]  ;;  %765 = vmatpush3.msra.mxu1 %v365_v11  ;;  %v377_v18 = vld [vmem:[#allocation11 + $0xb0] sm:$0xff]  ;;  %v376_v20 = vld [vmem:[#allocation11 + $0xa8] sm:$0xff] }
  0x4c   :  { %229 = vmatprep.subr.mxu0 %v1027_v0  ;;  %v154_v63 = vld [vmem:[#allocation3 + $0x28] sm:$0xff]  ;;  %v156_v7 = vld [vmem:[#allocation3 + $0x38] sm:$0xff]  ;;  %766 = vmatprep.subr.mxu1 %v380_v12  ;;  %v361_v19 = vld [vmem:[#allocation11 + $0x30] sm:$0xff] }
  0x4d   :  { %230 = vmatpush1.msra.mxu0 %v162_v40  ;;  %767 = vmatpush3.msra.mxu1 %v364_v13  ;;  %v375_v21 = vld [vmem:[#allocation11 + $0xa0] sm:$0xff]  ;;  %v374_v23 = vld [vmem:[#allocation11 + $0x98] sm:$0xff]  ;;  %v373_v25 = vld [vmem:[#allocation11 + $0x90] sm:$0xff] }
  0x4e   :  { %231 = vmatprep.subr.mxu0 %v1027_v0  ;;  %768 = vmatprep.subr.mxu1 %v379_v14  ;;  %v359_v22 = vld [vmem:[#allocation11 + $0x20] sm:$0xff]  ;;  %v358_v24 = vld [vmem:[#allocation11 + $0x18] sm:$0xff]  ;;  %v357_v26 = vld [vmem:[#allocation11 + $0x10] sm:$0xff] }
  0x4f   :  { %232 = vmatpush1.msra.mxu0 %v161_v43  ;;  %769 = vmatpush3.msra.mxu1 %v363_v15  ;;  %v372_v27 = vld [vmem:[#allocation11 + $0x88] sm:$0xff]  ;;  %v371_v29 = vld [vmem:[#allocation11 + $0x80] sm:$0xff]  ;;  %v601_v31 = vld [vmem:[#allocation12 + $0x38] sm:$0xff] }
  0x50   :  { %233 = vmatprep.subr.mxu0 %v1027_v0  ;;  %770 = vmatprep.subr.mxu1 %v378_v16  ;;  %v356_v28 = vld [vmem:[#allocation11 + $0x8] sm:$0xff]  ;;  %v355_v30 = vld [vmem:[#allocation11] sm:$0xff]  ;;  %v600_v32 = vld [vmem:[#allocation12 + $0x30] sm:$0xff] }
  0x51   :  { %234 = vmatpush1.msra.mxu0 %v160_v46  ;;  %771 = vmatpush3.msra.mxu1 %v362_v17  ;;  %v599_v33 = vld [vmem:[#allocation12 + $0x28] sm:$0xff]  ;;  %v598_v34 = vld [vmem:[#allocation12 + $0x20] sm:$0xff]  ;;  %v597_v35 = vld [vmem:[#allocation12 + $0x18] sm:$0xff] }
  0x52   :  { %235 = vmatprep.subr.mxu0 %v1027_v0  ;;  %772 = vmatprep.subr.mxu1 %v377_v18  ;;  %v596_v36 = vld [vmem:[#allocation12 + $0x10] sm:$0xff]  ;;  %v595_v37 = vld [vmem:[#allocation12 + $0x8] sm:$0xff]  ;;  %v594_v38 = vld [vmem:[#allocation12] sm:$0xff] }
  0x53   :  { %236 = vmatpush1.msra.mxu0 %v159_v47  ;;  %773 = vmatpush3.msra.mxu1 %v361_v19  ;;  %v743_v39 = vld [vmem:[%s1214_s2] ss:$0 sm:$0xff]  ;;  %v395_v13 = vld [vmem:[#allocation11 + $0x140] sm:$0xff]  ;;  %v394_v14 = vld [vmem:[#allocation11 + $0x138] sm:$0xff] }
  0x54   :  { %253 = vmatprep.subr.mxu0 %v1027_v0  ;;  %774 = vmatprep.subr.mxu1 %v376_v20  ;;  %v393_v18 = vld [vmem:[#allocation11 + $0x130] sm:$0xff]  ;;  %v392_v20 = vld [vmem:[#allocation11 + $0x128] sm:$0xff] }
  0x55   :  { %254 = vmatpush2.msra.mxu0 %v182_v48 }
  0x56   :  { %255 = vmatprep.subr.mxu0 %v1027_v0 }
  0x57   :  { %256 = vmatpush2.msra.mxu0 %v181_v49 }
  0x58   :  { %257 = vmatprep.subr.mxu0 %v1027_v0 }
  0x59   :  { %258 = vmatpush2.msra.mxu0 %v180_v50 }
  0x5a   :  { %259 = vmatprep.subr.mxu0 %v1027_v0 }
  0x5b   :  { %260 = vmatpush2.msra.mxu0 %v179_v51 }
  0x5c   :  { %261 = vmatprep.subr.mxu0 %v1027_v0 }
  0x5d   :  { %262 = vmatpush2.msra.mxu0 %v178_v52 }
  0x5e   :  { %263 = vmatprep.subr.mxu0 %v1027_v0 }
  0x5f   :  { %264 = vmatpush2.msra.mxu0 %v177_v53  ;;  %v401_v53 = vld [vmem:[#allocation11 + $0x170] sm:$0xff] }
  0x60   :  { %265 = vmatprep.subr.mxu0 %v1027_v0 }
  0x61   :  { %266 = vmatpush2.msra.mxu0 %v176_v54 }
  0x62   :  { %267 = vmatprep.subr.mxu0 %v1027_v0 }
  0x63   :  { %268 = vmatpush2.msra.mxu0 %v175_v55 }
  0x64   :  { %881 = vmatprep.subr.mxu0 %v601_v31 }
  0xb1   :  { %v118_v56 = vpop.permute.xlu0 %117 }
  0xb2   :  { %v122_v57 = vpop.permute.xlu1 %121  ;;  %133 = vst.msk [vmem:[#allocation3] sm:$0xff] %vm132_vm4, %v118_v56  ;;  %v400_v56 = vld [vmem:[#allocation11 + $0x168] sm:$0xff] }
  0xb3   :  { %135 = vst.msk [vmem:[#allocation3 + $0x20] sm:$0xff] %vm132_vm4, %v122_v57 }
  0xb5   :  { %v120_v58 = vpop.permute.xlu0 %119 }
  0xb6   :  { %v124_v59 = vpop.permute.xlu1 %123  ;;  %134 = vst.msk [vmem:[#allocation3 + $0x10] sm:$0xff] %vm132_vm4, %v120_v58 }
  0xb7   :  { %136 = vst.msk [vmem:[#allocation3 + $0x30] sm:$0xff] %vm132_vm4, %v124_v59 }
  0xb9   :  { %v149_v61 = vld [vmem:[#allocation3] sm:$0xff]  ;;  %v126_v62 = vpop.permute.xlu0 %125 }
  0xba   :  { %270 = vmatmul.mubr.f32.vlgmr.msra.gmra.mxu0 %v149_v61  ;;  %138 = vst.msk [vmem:[#allocation3 + $0x40] sm:$0xf] %vm137_vm5, %v126_v62  ;;  %v153_v6 = vld [vmem:[#allocation3 + $0x20] sm:$0xff]  ;;  %v399_v62 = vld [vmem:[#allocation11 + $0x160] sm:$0xff] }
  0xbb   :  { %745 = vmatprep.mubr.msk.f32.mxu0 %vm84_vm2, %v152_v60  ;;  %882 = vmatpush3.msra.mxu0 %v601_v31 }
  0xbc   :  { %883 = vmatprep.subr.mxu0 %v600_v32 }
  0xbd   :  { %v151_v5 = vld [vmem:[#allocation3 + $0x10] sm:$0xff]  ;;  %884 = vmatpush3.msra.mxu0 %v600_v32 }
  0xbe   :  { %275 = vmatmul.mubr.f32.gmra.mxu0 %v151_v5  ;;  %v155_v8 = vld [vmem:[#allocation3 + $0x30] sm:$0xff]  ;;  %885 = vmatprep.subr.mxu0 %v599_v33 }
  0xbf   :  { %746 = vmatprep.mubr.msk.f32.mxu0 %vm84_vm2, %v154_v63  ;;  %886 = vmatpush3.msra.mxu0 %v599_v33 }
  0xc0   :  { %887 = vmatprep.subr.mxu0 %v598_v34 }
  0xc1   :  { %v157_v10 = vld [vmem:[#allocation3 + $0x40] sm:$0xf]  ;;  %888 = vmatpush3.msra.mxu0 %v598_v34 }
  0xc2   :  { %280 = vmatmul.mubr.f32.gmra.mxu0 %v153_v6  ;;  %889 = vmatprep.subr.mxu0 %v597_v35  ;;  %v398_v6 = vld [vmem:[#allocation11 + $0x158] sm:$0xff] }
  0xc3   :  { %747 = vmatprep.mubr.msk.f32.mxu0 %vm84_vm2, %v156_v7  ;;  %890 = vmatpush3.msra.mxu0 %v597_v35 }
  0xc4   :  { %891 = vmatprep.subr.mxu0 %v596_v36 }
  0xc5   :  { %892 = vmatpush3.msra.mxu0 %v596_v36 }
  0xc6   :  { %285 = vmatmul.mubr.f32.gmra.mxu0 %v155_v8  ;;  %893 = vmatprep.subr.mxu0 %v595_v37 }
  0xc7   :  { %748 = vmatprep.mubr.msk.f32.mxu0 %vm84_vm2, %v158_v9  ;;  %894 = vmatpush3.msra.mxu0 %v595_v37  ;;  %v397_v9 = vld [vmem:[#allocation11 + $0x150] sm:$0xff] }
  0xc8   :  { %895 = vmatprep.subr.mxu0 %v594_v38 }
  0xc9   :  { %896 = vmatpush3.msra.mxu0 %v594_v38 }
  0xca   :  { %290 = vmatmul.mubr.f32.gmra.mxu0 %v157_v10  ;;  %v396_v10 = vld [vmem:[#allocation11 + $0x148] sm:$0xff] }
  0xcb   :  { %897 = vmatprep.mubr.msk.f32.mxu0 %vm84_vm2, %v1101_v1  ;;  %v360_v1 = vld [vmem:[#allocation11 + $0x28] sm:$0xff] }
  0xcc   :  { %775 = vmatpush3.msra.mxu1 %v360_v1  ;;  %v391_v1 = vld [vmem:[#allocation11 + $0x120] sm:$0xff] }
  0xcd   :  { %776 = vmatprep.subr.mxu1 %v375_v21 }
  0xce   :  { %777 = vmatpush3.msra.mxu1 %v359_v22  ;;  %898 = vmatmul.mubr.msk.f32.vlgmr.msra.gmra.mxu0 %vm84_vm2, %v1103_v2 }
  0xcf   :  { %778 = vmatprep.subr.mxu1 %v374_v23  ;;  %900 = vmatprep.mubr.msk.f32.mxu0 %vm84_vm2, %v1105_v3  ;;  %v390_v23 = vld [vmem:[#allocation11 + $0x118] sm:$0xff] }
  0xd0   :  { %779 = vmatpush3.msra.mxu1 %v358_v24  ;;  %v389_v24 = vld [vmem:[#allocation11 + $0x110] sm:$0xff] }
  0xd1   :  { %780 = vmatprep.subr.mxu1 %v373_v25  ;;  %v388_v25 = vld [vmem:[#allocation11 + $0x108] sm:$0xff] }
  0xd2   :  { %781 = vmatpush3.msra.mxu1 %v357_v26  ;;  %901 = vmatmul.mubr.msk.f32.gmra.mxu0 %vm84_vm2, %v1113_v4  ;;  %v402_v4 = vld [vmem:[#allocation11 + $0x178] sm:$0xff]  ;;  %v387_v26 = vld [vmem:[#allocation11 + $0x100] sm:$0xff] }
  0xd3   :  { %782 = vmatprep.subr.mxu1 %v372_v27 }
  0xd4   :  { %783 = vmatpush3.msra.mxu1 %v356_v28 }
  0xd5   :  { %784 = vmatprep.subr.mxu1 %v371_v29 }
  0xd6   :  { %785 = vmatpush3.msra.mxu1 %v355_v30 }
  0xd7   :  { %834 = vmatprep.subr.mxu1 %v1027_v0 }
 0x17a   :  { %v271_v40 = vpop.f32.mrf.mxu0 }
 0x17b   :  { %v272_v41 = vadd.f32 %v743_v39, %v271_v40 }
 0x17c   :  { %v273_v42 = vpop.f32.mrf.mxu0 }
 0x17d   :  { %v295_v43 = vmax.f32 %v272_v41, 0.0 }
 0x17e   :  { %v276_v44 = vpop.f32.mrf.mxu0 }
 0x17f   :  { %302 = vst [vmem:[#allocation4 + $0x1] sm:$0xff] %v295_v43  ;;  %v277_v45 = vadd.f32 %v743_v39, %v276_v44  ;;  %474 = vmatprep.mubr.f32.mxu1 %v295_v43 }
 0x180   :  { %v278_v46 = vpop.f32.mrf.mxu0 }
 0x181   :  { %v296_v2 = vmax.f32 %v277_v45, 0.0 }
 0x182   :  { %v281_v47 = vpop.f32.mrf.mxu0 }
 0x183   :  { %303 = vst [vmem:[#allocation4 + $0x9] sm:$0xff] %v296_v2  ;;  %v282_v3 = vadd.f32 %v743_v39, %v281_v47 }
 0x184   :  { %v283_v48 = vpop.f32.mrf.mxu0 }
 0x185   :  { %v297_v49 = vmax.f32 %v282_v3, 0.0 }
 0x186   :  { %v286_v50 = vpop.f32.mrf.mxu0  ;;  %v310_v51 = vld [vmem:[#allocation4] sm:$0xff] }
 0x187   :  { %306 = vst [vmem:[#allocation4 + $0x11] sm:$0xfc] %v297_v49  ;;  %v287_v52 = vadd.f32 %v743_v39, %v286_v50  ;;  %475 = vmatmul.mubr.f32.vlgmr.msra.gmra.mxu1 %v310_v51 }
 0x188   :  { %v288_v54 = vpop.f32.mrf.mxu0  ;;  %835 = vmatpush3.msra.mxu1 %v402_v4  ;;  %479 = vmatprep.mubr.f32.mxu1 %v296_v2 }
 0x189   :  { %v298_v55 = vmax.f32 %v287_v52, 0.0  ;;  %836 = vmatprep.subr.mxu1 %v1027_v0 }
 0x18a   :  { %v1173_v57 = vld [vmem:[#allocation4 + $0x2] sm:$0xff]  ;;  %v291_v58 = vpop.f32.mrf.mxu0  ;;  %837 = vmatpush3.msra.mxu1 %v401_v53  ;;  %v1175_v60 = vld [vmem:[#allocation4 + $0xa] sm:$0xff] }
 0x18b   :  { %v311_v59 = vld [vmem:[#allocation4 + $0x8] sm:$0xff]  ;;  %307 = vst [vmem:[#allocation4 + $0x19] sm:$0xff] %v298_v55  ;;  %v292_v61 = vadd.f32 %v743_v39, %v291_v58  ;;  %838 = vmatprep.subr.mxu1 %v1027_v0 }
 0x18c   :  { %480 = vmatmul.mubr.f32.gmra.mxu1 %v311_v59  ;;  %v293_v63 = vpop.f32.mrf.mxu0  ;;  %v749_v39 = vld [vmem:[%s1216_s4] ss:$0 sm:$0xff]  ;;  %s1030_s4 = smov [#allocation14]  }
 0x18d   :  { %839 = vmatpush3.msra.mxu1 %v400_v56  ;;  %v299_v5 = vmax.f32 %v292_v61, 0.0  ;;  %s729_s19 = sshll.u32 %s1030_s4, 4  ;;  %s730_s19 = int_to_ptr.vmem [resolvable:$true] %s729_s19 }
 0x18e   :  { %840 = vmatprep.subr.mxu1 %v1027_v0  ;;  %v322_v7 = vld [vmem:[#allocation4 + $0x11] sm:$0xff]  ;;  %v899_v37 = vpop.f32.mrf.mxu0  ;;  %s993_s20 = scalar_lea.vmem %s730_s19, 512  ;;  %p998_p7 = scmp.lt.s32.totalorder %s730_s19, %s730_s19 }
 0x18f   :  { %841 = vmatpush3.msra.mxu1 %v399_v62  ;;  %v312_v8 = vld [vmem:[#allocation4 + $0x10] sm:$0xff]  ;;  %308 = vst [vmem:[#allocation4 + $0x21] sm:$0x3] %v299_v5  ;;  %484 = vmatprep.mubr.f32.mxu1 %v322_v7  ;;  %p994_p6 = scmp.ne.s32.totalorder %s730_s19, %s993_s20  ;;  %p999_p8 = scmp.lt.s32.totalorder %s993_s20, %s993_s20 }
 0x190   :  { %842 = vmatprep.subr.mxu1 %v1027_v0  ;;  %485 = vmatmul.mubr.f32.gmra.mxu1 %v312_v8  ;;  %v680_v41 = vpop.f32.mrf.mxu0 }
 0x191   :  { %843 = vmatpush3.msra.mxu1 %v398_v6  ;;  %489 = vmatprep.mubr.f32.mxu1 %v298_v55  ;;  %p1000_p9 = por %p999_p8, %p998_p7 }
 0x192   :  { %844 = vmatprep.subr.mxu1 %v1027_v0  ;;  %v313_v11 = vld [vmem:[#allocation4 + $0x18] sm:$0xff]  ;;  %v902_v44 = vpop.f32.mrf.mxu0 }
 0x193   :  { %845 = vmatpush3.msra.mxu1 %v397_v9  ;;  %v332_v12 = vld [vmem:[#allocation4 + $0x12] sm:$0xff]  ;;  %v709_v56 = vrot.slane %v902_v44, 6  ;;  %p1001_p10 = pnand %p1000_p9, %p994_p6 }
 0x194   :  { %846 = vmatprep.subr.mxu1 %v1027_v0  ;;  %490 = vmatmul.mubr.f32.gmra.mxu1 %v313_v11  ;;  %v690_v49 = vpop.f32.mrf.mxu0 }
 0x195   :  { %847 = vmatpush3.msra.mxu1 %v396_v10  ;;  %v708_v55 = vrot.slane %v690_v49, 6 }
 0x196   :  { %848 = vmatprep.subr.mxu1 %v1027_v0  ;;  %v324_v15 = vld [vmem:[#allocation4 + $0x21] sm:$0xf] }
 0x197   :  { %849 = vmatpush3.msra.mxu1 %v395_v13  ;;  %v314_v16 = vld [vmem:[#allocation4 + $0x20] sm:$0xf]  ;;  %329 = vst [vmem:[#allocation5 + $0x60] sm:$0xf] %v324_v15  ;;  %v710_v6 = vsel %vm707_vm7, %v708_v55, %v709_v56 }
 0x198   :  { %v333_v17 = vld [vmem:[#allocation4 + $0x1a] sm:$0xff]  ;;  %850 = vmatprep.subr.mxu1 %v1027_v0  ;;  %319 = vst [vmem:[#allocation5 + $0x10] sm:$0xf] %v314_v16  ;;  %v334_v19 = vld [vmem:[#allocation4 + $0x22] sm:$0xf] }
 0x199   :  { %851 = vmatpush3.msra.mxu1 %v394_v14  ;;  %339 = vst [vmem:[#allocation5 + $0x8] sm:$0xf] %v334_v19 }
 0x19a   :  { %852 = vmatprep.subr.mxu1 %v1027_v0 }
 0x19b   :  { %853 = vmatpush3.msra.mxu1 %v393_v18 }
 0x19c   :  { %854 = vmatprep.subr.mxu1 %v1027_v0 }
 0x19d   :  { %855 = vmatpush3.msra.mxu1 %v392_v20 }
 0x19e   :  { %856 = vmatprep.subr.mxu1 %v1027_v0  ;;  %v353_v21 = vld [vmem:[#allocation5 + $0x60] sm:$0xf] }
 0x19f   :  { %v352_v22 = vld [vmem:[#allocation5 + $0x10] sm:$0xf]  ;;  %857 = vmatpush3.msra.mxu1 %v391_v1  ;;  %494 = vmatprep.mubr.f32.mxu1 %v353_v21 }
 0x1a0   :  { %858 = vmatprep.subr.mxu1 %v1027_v0  ;;  %495 = vmatmul.mubr.f32.gmra.mxu1 %v352_v22  ;;  %v354_v27 = vld [vmem:[#allocation5 + $0x8] sm:$0xf] }
 0x1a1   :  { %859 = vmatpush3.msra.mxu1 %v390_v23  ;;  %866 = vmatprep.mubr.msk.f32.mxu1 %vm1029_vm6, %v1027_v0 }
 0x1a2   :  { %860 = vmatprep.subr.mxu1 %v1027_v0 }
 0x1a3   :  { %861 = vmatpush3.msra.mxu1 %v389_v24 }
 0x1a4   :  { %862 = vmatprep.subr.mxu1 %v1027_v0 }
 0x1a5   :  { %863 = vmatpush3.msra.mxu1 %v388_v25 }
 0x1a6   :  { %864 = vmatprep.subr.mxu1 %v1027_v0 }
 0x1a7   :  { %865 = vmatpush3.msra.mxu1 %v387_v26 }
 0x1a8   :  { %867 = vmatmul.mubr.f32.vlgmr.msra.gmra.mxu1 %v1173_v57 }
 0x1a9   :  { %869 = vmatprep.mubr.msk.f32.mxu1 %vm1029_vm6, %v1027_v0 }
 0x1ac   :  { %870 = vmatmul.mubr.f32.gmra.mxu1 %v1175_v60 }
 0x1ad   :  { %872 = vmatprep.mubr.msk.f32.mxu1 %vm1029_vm6, %v1027_v0 }
 0x1b0   :  { %873 = vmatmul.mubr.f32.gmra.mxu1 %v332_v12 }
 0x1b1   :  { %875 = vmatprep.mubr.msk.f32.mxu1 %vm1029_vm6, %v1027_v0 }
 0x1b4   :  { %876 = vmatmul.mubr.f32.gmra.mxu1 %v333_v17 }
 0x1b5   :  { %878 = vmatprep.mubr.msk.f32.mxu1 %vm1029_vm6, %v1027_v0 }
 0x1b8   :  { %879 = vmatmul.mubr.f32.gmra.mxu1 %v354_v27 }
 0x247   :  { %v786_v28 = vpop.f32.mrf.mxu1 }
 0x249   :  { %v787_v29 = vpop.f32.mrf.mxu1 }
 0x24a   :  { %v788_v38 = vadd.f32 %v787_v29, %v786_v28 }
 0x24c   :  { %v789_v30 = vpop.f32.mrf.mxu1  ;;  %v477_v42 = vadd.f32 %v788_v38, %v749_v39 }
 0x24e   :  { %v790_v31 = vpop.f32.mrf.mxu1 }
 0x24f   :  { %v791_v0 = vadd.f32 %v790_v31, %v789_v30 }
 0x250   :  { %v792_v32 = vpop.f32.mrf.mxu1 }
 0x251   :  { %v482_v3 = vadd.f32 %v791_v0, %v749_v39 }
 0x252   :  { %v793_v33 = vpop.f32.mrf.mxu1 }
 0x253   :  { %v794_v2 = vadd.f32 %v793_v33, %v792_v32 }
 0x254   :  { %v795_v34 = vpop.f32.mrf.mxu1 }
 0x255   :  { %v487_v54 = vadd.f32 %v794_v2, %v749_v39 }
 0x256   :  { %v796_v35 = vpop.f32.mrf.mxu1 }
 0x257   :  { %v797_v52 = vadd.f32 %v796_v35, %v795_v34 }
 0x259   :  { %v492_v63 = vadd.f32 %v797_v52, %v749_v39 }
 0x260   :  { %v798_v36 = vpop.f32.mrf.mxu1 }
 0x262   :  { %v799_v40 = vpop.f32.mrf.mxu1 }
 0x263   :  { %v800_v61 = vadd.f32 %v799_v40, %v798_v36 }
 0x265   :  { %v497_v11 = vadd.f32 %v800_v61, %v749_v39 }
 0x268   :  { %v566_v43 = vpop.f32.mrf.mxu1 }
 0x269   :  { %v567_v45 = vadd.f32 %v566_v43, %v477_v42 }
 0x26a   :  { %v868_v46 = vpop.f32.mrf.mxu1 }
 0x26b   :  { %v699_v47 = vadd.f32 %v680_v41, %v567_v45 }
 0x26c   :  { %v571_v48 = vpop.f32.mrf.mxu1 }
 0x26d   :  { %v701_v4 = vmax.f32 %v699_v47, 0.0  ;;  %v572_v50 = vadd.f32 %v571_v48, %v482_v3 }
 0x26e   :  { %v871_v51 = vpop.f32.mrf.mxu1 }
 0x26f   :  { %703 = vst [vmem:[#allocation14] sm:$0xff] %v701_v4  ;;  %v700_v53 = vadd.f32 %v899_v37, %v572_v50 }
 0x270   :  { %v576_v57 = vpop.f32.mrf.mxu1 }
 0x271   :  { %v702_v58 = vmax.f32 %v700_v53, 0.0  ;;  %v577_v59 = vadd.f32 %v576_v57, %v487_v54 }
 0x272   :  { %v874_v60 = vpop.f32.mrf.mxu1 }
 0x273   :  { %704 = vst [vmem:[#allocation14 + $0x8] sm:$0xff] %v702_v58  ;;  %v714_v62 = vadd.f32 %v708_v55, %v577_v59 }
 0x274   :  { %v581_v5 = vpop.f32.mrf.mxu1 }
 0x275   :  { %v717_v7 = vmax.f32 %v714_v62, 0.0  ;;  %v582_v8 = vadd.f32 %v581_v5, %v492_v63 }
 0x276   :  { %v877_v9 = vpop.f32.mrf.mxu1 }
 0x277   :  { %721 = vst [vmem:[#allocation14 + $0xe] sm:$0xfc] %v717_v7  ;;  %v715_v10 = vadd.f32 %v710_v6, %v582_v8 }
 0x278   :  { %v586_v12 = vpop.f32.mrf.mxu1 }
 0x279   :  { %v718_v13 = vmax.f32 %v715_v10, 0.0  ;;  %v587_v14 = vadd.f32 %v586_v12, %v497_v11 }
 0x27a   :  { %v880_v15 = vpop.f32.mrf.mxu1 }
 0x27b   :  { %722 = vst [vmem:[#allocation14 + $0x16] sm:$0xff] %v718_v13  ;;  %v716_v16 = vadd.f32 %v709_v56, %v587_v14 }
 0x27d   :  { %v719_v17 = vmax.f32 %v716_v16, 0.0 }
 0x27f   :  { %723 = vst [vmem:[#allocation14 + $0x1e] sm:$0x3] %v719_v17 }
 0x280   :  { %1004 = shalt.err (!%p1001_p10)
}
 0x281   :  { %735 = dma.vmem_to_hbm [thread:$0]  %s730_s19, 512, %s1218_s6, [#allocation8], %s1023_s26, %s1023_s26, %s1024_s27  }
 0x282   :  { %1019 = dma.done.wait [#allocation8], 512  }
 0x283   :  { %1020 = vsyncadd [#allocation8], 4294966784 }
 0x284   :  { %739 = vsyncpa [#allocation7], 1 }
 0x285   :  { %740 = vsyncpa [#allocation10], 1 }
 0x286   :  { %741 = vsyncpa [#allocation13], 1 }
 0x287   :  { %742 = vsyncpa [#allocation8], 1 }

</bundles_post_ra>
